<compile_context>
chip_gen: v5e
topology: v5e:2x2
jax: 0.10.0
libtpu: 0.0.40
codegen_flags: <defaults>
</compile_context>

<pallas_src>
import functools

import jax
import jax.numpy as jnp
from jax import lax
from jax.experimental import pallas as pl
from jax.experimental.pallas import tpu as pltpu

EPS = 1e-5
NEG_SLOPE = 0.2


def _conv_in_lrelu_kernel(x_ref, w_ref, m_ref, o_ref, *, offsets, Lw_pad, inv_n):
    """One grid step == one batch element.

    x_ref: (C_sd, L_x)      bf16  space-to-depth'd, flattened, zero-padded input
    w_ref: (T, C_out, C_sd) bf16  per-tap GEMM weights
    m_ref: (1, Lw_pad)      f32   1.0 on valid output positions, 0.0 elsewhere
    o_ref: (C_out, Lw_pad)  f32   wide output (pad/garbage cols sliced off later)
    """
    # ---- conv: T accumulated GEMMs over static lane-shifted views of X ------
    acc = jnp.dot(w_ref[0], x_ref[:, offsets[0]:offsets[0] + Lw_pad],
                  preferred_element_type=jnp.float32)
    for t in range(1, len(offsets)):
        off = offsets[t]
        acc = acc + jnp.dot(w_ref[t], x_ref[:, off:off + Lw_pad],
                            preferred_element_type=jnp.float32)

    # ---- InstanceNorm2d over valid spatial positions (biased variance) ------
    mask = m_ref[...]                                            # (1, Lw_pad)
    mean = jnp.sum(acc * mask, axis=1, keepdims=True) * inv_n    # (C_out, 1)
    centered = (acc - mean) * mask
    var = jnp.sum(centered * centered, axis=1, keepdims=True) * inv_n
    y = (acc - mean) * lax.rsqrt(var + EPS)

    # ---- LeakyReLU(0.2) ------------------------------------------------------
    out = jnp.where(y >= 0.0, y, NEG_SLOPE * y)
    o_ref[...] = out.astype(o_ref.dtype)


def conv_instancenorm_leakyrelu(x, weight, bias, stride):
    """x: (N, C_in, H, W) f32; weight: (C_out, C_in, 4, 4) f32; bias: (C_out,).

    The conv bias is mathematically cancelled by InstanceNorm's mean
    subtraction (no affine params), so it is not used in the kernel path.
    """
    del bias  # exactly cancelled by instance norm
    N, C_in, H, W = x.shape
    C_out, _, KH, KW = weight.shape
    s = int(stride)
    pad = 1

    H_pad, W_pad = H + 2 * pad, W + 2 * pad
    H_out = (H_pad - KH) // s + 1
    W_out = (W_pad - KW) // s + 1

    # ---- glue: reflect pad + stride-s space-to-depth (data volume ~1x) ------
    Hs, Ws = -(-H_pad // s), -(-W_pad // s)
    x_pad = jnp.pad(x, ((0, 0), (0, 0), (pad, pad), (pad, pad)), mode="reflect")
    x_pp = jnp.pad(x_pad,
                   ((0, 0), (0, 0), (0, Hs * s - H_pad), (0, Ws * s - W_pad)))
    # x_sd[n, c, rh, rw, a, b] = x_pad[n, c, s*a + rh, s*b + rw]
    x_sd = x_pp.reshape(N, C_in, Hs, s, Ws, s).transpose(0, 1, 3, 5, 2, 4)
    C_sd = C_in * s * s
    X = x_sd.reshape(N, C_sd, Hs * Ws)

    # per-tap lane offsets for the reduced stride-1 ceil(4/s) x ceil(4/s) conv
    KHs, KWs = -(-KH // s), -(-KW // s)
    T = KHs * KWs
    offsets = tuple(qh * Ws + qw for qh in range(KHs) for qw in range(KWs))

    Lw = H_out * Ws                               # "wide" flattened output len
    Lw_pad = ((Lw + 127) // 128) * 128            # lane-dense output block
    L_need = max(max(offsets) + Lw_pad, Hs * Ws)
    L_x = ((L_need + 127) // 128) * 128           # lane-align the input slab
    X = jnp.pad(X, ((0, 0), (0, 0), (0, L_x - Hs * Ws))).astype(jnp.bfloat16)

    # weights: (C_out, C_in, KH, KW) -> (T, C_out, C_sd), K-order (c, rh, rw)
    w_pp = jnp.pad(weight,
                   ((0, 0), (0, 0), (0, KHs * s - KH), (0, KWs * s - KW)))
    w_r = w_pp.reshape(C_out, C_in, KHs, s, KWs, s).transpose(2, 4, 0, 1, 3, 5)
    w_mat = w_r.reshape(T, C_out, C_sd).astype(jnp.bfloat16)

    # validity mask over the wide output: lane p valid iff p < Lw and
    # (p mod Ws) < W_out.  Precomputed host-side (tiny, fetched once).
    col = jnp.arange(Lw_pad, dtype=jnp.int32)
    mask = jnp.logical_and(col < Lw, (col % Ws) < W_out)
    mask = mask.astype(jnp.float32).reshape(1, Lw_pad)
    inv_n = 1.0 / float(H_out * W_out)

    kernel = functools.partial(_conv_in_lrelu_kernel,
                               offsets=offsets, Lw_pad=Lw_pad, inv_n=inv_n)

    out_wide = pl.pallas_call(
        kernel,
        out_shape=jax.ShapeDtypeStruct((N, C_out, Lw_pad), jnp.float32),
        grid_spec=pltpu.PrefetchScalarGridSpec(
            num_scalar_prefetch=0,
            grid=(N,),
            in_specs=[
                pl.BlockSpec((None, C_sd, L_x), lambda n: (n, 0, 0)),
                pl.BlockSpec((T, C_out, C_sd), lambda n: (0, 0, 0)),
                pl.BlockSpec((1, Lw_pad), lambda n: (0, 0)),
            ],
            out_specs=pl.BlockSpec((None, C_out, Lw_pad), lambda n: (n, 0, 0)),
        ),
        compiler_params=pltpu.CompilerParams(
            dimension_semantics=("parallel",),
            vmem_limit_bytes=48 * 1024 * 1024,
        ),
    )(X, w_mat, mask)

    # (N, C_out, Lw_pad) -> drop pad cols -> (N, C_out, H_out, Ws) -> NCHW
    out = out_wide[:, :, :Lw].reshape(N, C_out, H_out, Ws)[..., :W_out]
    return out


def _reference(x, weight, bias, stride):
    """Pure-JAX f32 reference mirroring the PyTorch module semantics."""
    pad = 1
    x_pad = jnp.pad(x, ((0, 0), (0, 0), (pad, pad), (pad, pad)), mode="reflect")
    y = lax.conv_general_dilated(
        x_pad, weight, window_strides=(stride, stride), padding="VALID",
        dimension_numbers=("NCHW", "OIHW", "NCHW"))
    y = y + bias.reshape(1, -1, 1, 1)
    mean = jnp.mean(y, axis=(2, 3), keepdims=True)
    var = jnp.mean((y - mean) ** 2, axis=(2, 3), keepdims=True)
    y = (y - mean) * lax.rsqrt(var + EPS)
    return jnp.where(y >= 0, y, NEG_SLOPE * y)


if __name__ == "__main__":
    # Small deterministic example: batch=2, in_channels=4, out_channels=8,
    # spatial 16x16, stride=2  ->  output (2, 8, 8, 8)
    N, C_in, H, W = 2, 4, 16, 16
    C_out, stride = 8, 2

    key = jax.random.PRNGKey(0)
    kx, kw, kb = jax.random.split(key, 3)
    x = jax.random.normal(kx, (N, C_in, H, W), dtype=jnp.float32)
    weight = 0.1 * jax.random.normal(kw, (C_out, C_in, 4, 4), dtype=jnp.float32)
    bias = 0.1 * jax.random.normal(kb, (C_out,), dtype=jnp.float32)

    out = conv_instancenorm_leakyrelu(x, weight, bias, stride)
    out = jax.block_until_ready(out)

    ref = _reference(x, weight, bias, stride)
    assert out.shape == ref.shape, (out.shape, ref.shape)
    # bf16 MXU operands (f32 accumulation) -> slightly loosened tolerance.
    err = float(jnp.max(jnp.abs(out - ref)))
    assert jnp.allclose(out, ref, atol=2e-2, rtol=2e-2), f"mismatch, max|err|={err}"

    print("KERNEL_OK")
</pallas_src>

<mosaic_0001>
module attributes {stable_mosaic.version = 11 : i64} {
  func.func @_conv_in_lrelu_kernel(%arg0: i32, %arg1: memref<1x16x256xbf16, #tpu.memory_space<vmem>>, %arg2: memref<4x8x16xbf16, #tpu.memory_space<vmem>>, %arg3: memref<1x128xf32, #tpu.memory_space<vmem>>, %arg4: memref<1x8x128xf32, #tpu.memory_space<vmem>>) attributes {dimension_semantics = [#tpu.dimension_semantics<parallel>], iteration_bounds = array<i64: 2>, scalar_prefetch = 0 : i64, scratch_operands = 0 : i64, tpu.core_type = #tpu.core_type<tc>, window_params = [{transform_indices = @transform_0, window_bounds = array<i64: 1, 16, 256>}, {pipeline_mode = #tpu.pipeline_mode<synchronous>, transform_indices = @transform_1, window_bounds = array<i64: 4, 8, 16>}, {pipeline_mode = #tpu.pipeline_mode<synchronous>, transform_indices = @transform_2, window_bounds = array<i64: 1, 128>}, {transform_indices = @transform_3, window_bounds = array<i64: 1, 8, 128>}]} {
    %c0 = arith.constant 0 : index
    %c0_0 = arith.constant 0 : index
    %c0_1 = arith.constant 0 : index
    %0 = vector.load %arg2[%c0, %c0_0, %c0_1] : memref<4x8x16xbf16, #tpu.memory_space<vmem>>, vector<1x8x16xbf16>
    %1 = vector.shape_cast %0 : vector<1x8x16xbf16> to vector<8x16xbf16>
    %c0_2 = arith.constant 0 : index
    %c0_3 = arith.constant 0 : index
    %c0_4 = arith.constant 0 : index
    %2 = vector.load %arg1[%c0_2, %c0_3, %c0_4] : memref<1x16x256xbf16, #tpu.memory_space<vmem>>, vector<1x16x128xbf16>
    %3 = vector.shape_cast %2 : vector<1x16x128xbf16> to vector<16x128xbf16>
    %cst = arith.constant dense<0.000000e+00> : vector<8x128xf32>
    %4 = tpu.matmul %1, %3, %cst {dimension_numbers = #tpu.dot_dimension_numbers<[1], [0], [0], [1], [0, 0, 1, 1], [], []>} : vector<8x16xbf16>, vector<16x128xbf16>, vector<8x128xf32> -> vector<8x128xf32>
    %c1 = arith.constant 1 : index
    %c0_5 = arith.constant 0 : index
    %c0_6 = arith.constant 0 : index
    %5 = vector.load %arg2[%c1, %c0_5, %c0_6] : memref<4x8x16xbf16, #tpu.memory_space<vmem>>, vector<1x8x16xbf16>
    %6 = vector.shape_cast %5 : vector<1x8x16xbf16> to vector<8x16xbf16>
    %c0_7 = arith.constant 0 : index
    %c0_8 = arith.constant 0 : index
    %c1_9 = arith.constant 1 : index
    %7 = vector.load %arg1[%c0_7, %c0_8, %c1_9] : memref<1x16x256xbf16, #tpu.memory_space<vmem>>, vector<1x16x128xbf16>
    %8 = vector.shape_cast %7 : vector<1x16x128xbf16> to vector<16x128xbf16>
    %cst_10 = arith.constant dense<0.000000e+00> : vector<8x128xf32>
    %9 = tpu.matmul %6, %8, %cst_10 {dimension_numbers = #tpu.dot_dimension_numbers<[1], [0], [0], [1], [0, 0, 1, 1], [], []>} : vector<8x16xbf16>, vector<16x128xbf16>, vector<8x128xf32> -> vector<8x128xf32>
    %10 = arith.addf %4, %9 : vector<8x128xf32>
    %c2 = arith.constant 2 : index
    %c0_11 = arith.constant 0 : index
    %c0_12 = arith.constant 0 : index
    %11 = vector.load %arg2[%c2, %c0_11, %c0_12] : memref<4x8x16xbf16, #tpu.memory_space<vmem>>, vector<1x8x16xbf16>
    %12 = vector.shape_cast %11 : vector<1x8x16xbf16> to vector<8x16xbf16>
    %c0_13 = arith.constant 0 : index
    %c0_14 = arith.constant 0 : index
    %c9 = arith.constant 9 : index
    %13 = vector.load %arg1[%c0_13, %c0_14, %c9] : memref<1x16x256xbf16, #tpu.memory_space<vmem>>, vector<1x16x128xbf16>
    %14 = vector.shape_cast %13 : vector<1x16x128xbf16> to vector<16x128xbf16>
    %cst_15 = arith.constant dense<0.000000e+00> : vector<8x128xf32>
    %15 = tpu.matmul %12, %14, %cst_15 {dimension_numbers = #tpu.dot_dimension_numbers<[1], [0], [0], [1], [0, 0, 1, 1], [], []>} : vector<8x16xbf16>, vector<16x128xbf16>, vector<8x128xf32> -> vector<8x128xf32>
    %16 = arith.addf %10, %15 : vector<8x128xf32>
    %c3 = arith.constant 3 : index
    %c0_16 = arith.constant 0 : index
    %c0_17 = arith.constant 0 : index
    %17 = vector.load %arg2[%c3, %c0_16, %c0_17] : memref<4x8x16xbf16, #tpu.memory_space<vmem>>, vector<1x8x16xbf16>
    %18 = vector.shape_cast %17 : vector<1x8x16xbf16> to vector<8x16xbf16>
    %c0_18 = arith.constant 0 : index
    %c0_19 = arith.constant 0 : index
    %c10 = arith.constant 10 : index
    %19 = vector.load %arg1[%c0_18, %c0_19, %c10] : memref<1x16x256xbf16, #tpu.memory_space<vmem>>, vector<1x16x128xbf16>
    %20 = vector.shape_cast %19 : vector<1x16x128xbf16> to vector<16x128xbf16>
    %cst_20 = arith.constant dense<0.000000e+00> : vector<8x128xf32>
    %21 = tpu.matmul %18, %20, %cst_20 {dimension_numbers = #tpu.dot_dimension_numbers<[1], [0], [0], [1], [0, 0, 1, 1], [], []>} : vector<8x16xbf16>, vector<16x128xbf16>, vector<8x128xf32> -> vector<8x128xf32>
    %22 = arith.addf %16, %21 : vector<8x128xf32>
    %c0_21 = arith.constant 0 : index
    %c0_22 = arith.constant 0 : index
    %23 = vector.load %arg3[%c0_21, %c0_22] : memref<1x128xf32, #tpu.memory_space<vmem>>, vector<1x128xf32>
    %24 = vector.broadcast %23 : vector<1x128xf32> to vector<8x128xf32>
    %25 = arith.mulf %22, %24 : vector<8x128xf32>
    %cst_23 = arith.constant dense<0.000000e+00> : vector<8xf32>
    %26 = vector.multi_reduction <add>, %25, %cst_23 [1] : vector<8x128xf32> to vector<8xf32>
    %27 = vector.shape_cast %26 : vector<8xf32> to vector<8x1xf32>
    %cst_24 = arith.constant 1.562500e-02 : f32
    %28 = vector.broadcast %cst_24 : f32 to vector<8x1xf32>
    %29 = arith.mulf %27, %28 : vector<8x1xf32>
    %30 = vector.broadcast %29 : vector<8x1xf32> to vector<8x128xf32>
    %31 = arith.subf %22, %30 : vector<8x128xf32>
    %32 = vector.broadcast %23 : vector<1x128xf32> to vector<8x128xf32>
    %33 = arith.mulf %31, %32 : vector<8x128xf32>
    %34 = arith.mulf %33, %33 : vector<8x128xf32>
    %cst_25 = arith.constant dense<0.000000e+00> : vector<8xf32>
    %35 = vector.multi_reduction <add>, %34, %cst_25 [1] : vector<8x128xf32> to vector<8xf32>
    %36 = vector.shape_cast %35 : vector<8xf32> to vector<8x1xf32>
    %cst_26 = arith.constant 1.562500e-02 : f32
    %37 = vector.broadcast %cst_26 : f32 to vector<8x1xf32>
    %38 = arith.mulf %36, %37 : vector<8x1xf32>
    %39 = vector.broadcast %29 : vector<8x1xf32> to vector<8x128xf32>
    %40 = arith.subf %22, %39 : vector<8x128xf32>
    %cst_27 = arith.constant 9.99999974E-6 : f32
    %41 = vector.broadcast %cst_27 : f32 to vector<8x1xf32>
    %42 = arith.addf %38, %41 : vector<8x1xf32>
    %43 = math.rsqrt %42 : vector<8x1xf32>
    %44 = vector.broadcast %43 : vector<8x1xf32> to vector<8x128xf32>
    %45 = arith.mulf %40, %44 : vector<8x128xf32>
    %cst_28 = arith.constant 0.000000e+00 : f32
    %46 = vector.broadcast %cst_28 : f32 to vector<8x128xf32>
    %47 = arith.cmpf oge, %45, %46 : vector<8x128xf32>
    %cst_29 = arith.constant 2.000000e-01 : f32
    %48 = vector.broadcast %cst_29 : f32 to vector<8x128xf32>
    %49 = arith.mulf %48, %45 : vector<8x128xf32>
    %50 = arith.select %47, %45, %49 : vector<8x128xi1>, vector<8x128xf32>
    %c0_30 = arith.constant 0 : index
    %c0_31 = arith.constant 0 : index
    %c0_32 = arith.constant 0 : index
    %51 = vector.load %arg4[%c0_30, %c0_31, %c0_32] : memref<1x8x128xf32, #tpu.memory_space<vmem>>, vector<1x8x128xf32>
    %52 = vector.shape_cast %51 : vector<1x8x128xf32> to vector<8x128xf32>
    %53 = vector.shape_cast %50 : vector<8x128xf32> to vector<1x8x128xf32>
    tpu.vector_store %arg4[%c0_30, %c0_31, %c0_32], %53 {strides = array<i32>} : memref<1x8x128xf32, #tpu.memory_space<vmem>>, vector<1x8x128xf32>,
    return
  }
  func.func @transform_0(%arg0: i32) -> (i32, i32, i32) {
    %c0_i32 = arith.constant 0 : i32
    %c0_i32_0 = arith.constant 0 : i32
    %c0_i32_1 = arith.constant 0 : i32
    return %arg0, %c0_i32, %c0_i32_0 : i32, i32, i32
  }
  func.func @transform_1(%arg0: i32) -> (i32, i32, i32) {
    %c0_i32 = arith.constant 0 : i32
    %c0_i32_0 = arith.constant 0 : i32
    %c0_i32_1 = arith.constant 0 : i32
    %c0_i32_2 = arith.constant 0 : i32
    return %c0_i32, %c0_i32_0, %c0_i32_1 : i32, i32, i32
  }
  func.func @transform_2(%arg0: i32) -> (i32, i32) {
    %c0_i32 = arith.constant 0 : i32
    %c0_i32_0 = arith.constant 0 : i32
    %c0_i32_1 = arith.constant 0 : i32
    return %c0_i32, %c0_i32_0 : i32, i32
  }
  func.func @transform_3(%arg0: i32) -> (i32, i32, i32) {
    %c0_i32 = arith.constant 0 : i32
    %c0_i32_0 = arith.constant 0 : i32
    %c0_i32_1 = arith.constant 0 : i32
    return %arg0, %c0_i32, %c0_i32_0 : i32, i32, i32
  }
}

</mosaic_0001>

<bundles_post_ra>
// kernel: tpu_custom_call.1
= control target key start
LH: loop header
LB: loop body
LE: loop exit
PB: predicated region body
PF: predicated region fallthrough
CT: control target
= control target key end

     0   :  { %8 = vsyncpa [#allocation3], 0  ;;  %s858_s0 = inlined_call_operand.hbm [shape: bf16[2,16,256], index: 0, kind: input, shape index: {}]   ;;  %s859_s1 = inlined_call_operand.hbm [shape: bf16[4,8,16], index: 1, kind: input, shape index: {}]   ;;  %s860_s2 = inlined_call_operand.vmem [shape: f32[1,128], index: 2, kind: input, shape index: {}]   ;;  %s861_s3 = inlined_call_operand.hbm [shape: f32[2,8,128], index: 3, kind: output, shape index: {}]  }
   0x1   :  { %10 = vsyncpa [#allocation3 + $0x1], 0 }
   0x2   :  { %11 = vsyncpa [#allocation6], 0 }
   0x3   :  { %12 = vsyncpa [#allocation4], 0 }
   0x4   :  { %14 = vsyncpa [#allocation4 + $0x1], 0  ;;  %s710_s12 = smov 0   ;;  %s712_s13 = smov 0  }
   0x5   :  { %s714_s14 = smov 0   ;;  %s716_s15 = smov 0  }
   0x6 LB: > { %s731_s16 = sadd.s32 4294967295, %s680_s15   ;;  %s448_s17 = sadd.s32 4294967294, %s680_s15   ;;  %s680_s15 = sphi %s716_s15, %s871_s15   ;;  %s676_s14 = sphi %s714_s14, %s870_s14   ;;  %s672_s13 = sphi %s712_s13, %s869_s13   ;;  %s668_s12 = sphi %s710_s12, %s868_s12  }
   0x7   : > { %p40_p0 = scmp.ne.s32.totalorder %s672_s13, %s668_s12  ;;  %p41_p1 = scmp.eq.s32.totalorder %s731_s16, 0 }
   0x8   : > { %p106_p2 = scmp.eq.s32.totalorder %s731_s16, 1  ;;  %p112_p3 = scmp.eq.s32.totalorder %s448_s17, 1 }
   0x9   : > { %p740_p4 = por %p41_p1, %p40_p0  ;;  %p449_p5 = scmp.ge.s32.totalorder %s680_s15, 1 }
   0xa   : > { %p745_p6 = por %p112_p3, %p40_p0  ;;  %p119_p7 = scmp.lt.s32.totalorder %s680_s15, 3 }
   0xb   : > { %s130_s22 = sshll.u32 %s859_s1, 4  ;;  %s682_s24 = smov [#allocation5]   ;;  %s131_s22 = int_to_ptr.hbm [resolvable:$true] %s130_s22 }
   0xc   : > { %p753_p8 = pnand %p449_p5, %p119_p7  ;;  %s132_s25 = sshll.u32 %s682_s24, 4  ;;  %s133_s25 = int_to_ptr.vmem [resolvable:$true] %s132_s25 }
   0xd   : > { %s763_s26 = sadd.s32 1, %s680_s15   ;;  %s683_s27 = smov 64  }
   0xe   : > { %p491_p9 = pneg %p753_p8  ;;  %s684_s28 = smov 4  }
   0xf   : > { %s24_s29 = ssub.s32 %s680_s15, %s763_s26  ;;  %s27_s30 = sadd.s32 1, %s676_s14 }
  0x10   : > { %p492_p10 = pnand %p491_p9, %p41_p1  ;;  %p25_p12 = scmp.eq.s32.totalorder %s24_s29, 0 }
  0x11   : > { %p34_p13 = scmp.ne.s32.totalorder %s676_s14, %s672_s13  ;;  %p35_p0 = scmp.eq.s32.totalorder %s680_s15, 0 }
  0x12   : > { %494 = dma.hbm_to_vmem [thread:$0]  (!%p492_p10), %s131_s22, 256, %s133_s25, [#allocation6], %s683_s27, %s683_s27, %s684_s28  }
  0x13   : > { %p504_p3 = scmp.lt.s32.totalorder %s680_s15, 2  ;;  %p36_p5 = por %p35_p0, %p34_p13 }
  0x14   : > { %s773_s4 = scalar_select %p25_p12, %s676_s14, %s27_s30  }
  0x15   : > { %p777_p7 = por %p106_p2, %p34_p13  ;;  %s149_s6 = sand.u32 1, %s676_s14  }
  0x16   : > { %s479_s7 = sshll.u32 %s680_s15, 4  ;;  %s452_s8 = sshll.u32 %s149_s6, 4 }
  0x17   : > { %s158_s11 = scalar_lea.hbm %s858_s0, %s479_s7  ;;  %s153_s20 = scalar_lea.vmem [#allocation2], %s452_s8 }
  0x18   : > { %s159_s17 = sshll.u32 %s158_s11, 4  ;;  %s161_s21 = sshll.u32 %s153_s20, 4  ;;  %s160_s17 = int_to_ptr.hbm [resolvable:$true] %s159_s17  ;;  %s162_s21 = int_to_ptr.vmem [resolvable:$true] %s161_s21 }
  0x19   : > { %p788_p9 = pnand %p504_p3, %p36_p5  ;;  %s150_s24 = scalar_lea.sflag [#allocation3], %s149_s6 }
  0x1a   : > { %s580_s25 = sshra.s32 %s160_s17, 4  ;;  %s587_s30 = scalar_lea.hbm %s858_s0, 32  ;;  %s581_s25 = int_to_ptr.hbm [resolvable:$true] %s580_s25 }
  0x1b   : > { %s582_s27 = scalar_lea.hbm %s581_s25, 16  ;;  %p584_p10 = pneg %p788_p9 }
  0x1c   : > { %p583_p2 = scmp.ne.s32.totalorder %s581_s25, %s582_s27  ;;  %p588_p0 = scmp.lt.s32.totalorder %s581_s25, %s858_s0 }
  0x1d   : > { %p589_p3 = scmp.lt.s32.totalorder %s587_s30, %s582_s27 }
  0x1e   : > { %p585_p12 = pnand %p584_p10, %p583_p2 }
  0x1f   : > { %p590_p5 = por %p589_p3, %p588_p0 }
  0x20   : > { %p586_p13 = pneg %p585_p12 }
  0x22   : > { %p591_p11 = pnand %p590_p5, %p586_p13 }
  0x24   : > { %594 = shalt.err (!%p591_p11)
}
  0x25   : > { %s685_s6 = smov 128   ;;  %s686_s9 = smov 8  }
  0x26   : > { %498 = dma.hbm_to_vmem [thread:$0]  (!%p788_p9), %s160_s17, 256, %s162_s21, %s150_s24, %s685_s6, %s685_s6, %s686_s9  }
  0x27   : > { %173 = sbr.rel (%p753_p8) target bundleno = 585 (0x249), region = 32  ;;  %s805_s10 = sand.u32 (!%p753_p8), 1, %s672_s13  }
  0x28   : > { %s456_s11 = sshll.u32 (!%p753_p8), %s805_s10, 4  ;;  %s176_s20 = scalar_lea.sflag (!%p753_p8), [#allocation3], %s805_s10 }
  0x29   : > { %s179_s25 = scalar_lea.vmem (!%p753_p8), [#allocation2], %s456_s11 }
  0x2c   : > { %655 = dma.done.wait (%p740_p4), %s176_s20, 256  }
  0x2d   : > { %657 = vsyncadd (%p740_p4), %s176_s20, 4294967040 }
  0x2e   : > { %659 = dma.done.wait (%p41_p1), [#allocation6], 256  }
  0x2f   : > { %661 = vsyncadd (%p41_p1), [#allocation6], 4294967040  ;;  %v461_v0 = vld [vmem:[%s179_s25] sm:$0xf]  ;;  %v482_v1 = vld [vmem:[%s179_s25 + $0x4] sm:$0xf0] }
  0x30   : > { %v462_v2 = vor.u32 %v482_v1, %v461_v0  ;;  %s687_s23 = smov 118   ;;  %s688_s17 = smov 119   ;;  %v481_v3 = vld [vmem:[%s179_s25 + $0x4] sm:$0xf]  ;;  %v463_v4 = vld [vmem:[%s179_s25 + $0x8] sm:$0xf0] }
  0x31   : > { %s689_s21 = smov 127   ;;  %v466_v5 = vor.u32 %v481_v3, %v463_v4  ;;  %v470_v6 = vld [vmem:[%s179_s25] sm:$0xf]  ;;  %v480_v7 = vld [vmem:[%s179_s25 + $0x4] sm:$0xf0]  ;;  %vm231_vm0 = vcmask 130048  }
  0x32   : > { %298 = vrot.lane.b32.xlu1 %v462_v2, %s687_s23  ;;  %272 = vrot.lane.b32.xlu0 %v462_v2, %s688_s17  ;;  %v471_v8 = vor.u32 %v480_v7, %v470_v6  ;;  %v209_v9 = vld [vmem:[#allocation5] sm:$0xf]  ;;  %vm228_vm1 = vcmask 1039360   ;;  %v213_v13 = vld [vmem:[#allocation5 + $0x4] sm:$0xf]  ;;  %vm276_vm2 = vcmask 973824  }
  0x33   : > { %224 = vrot.lane.b32.xlu2 %v462_v2, %s689_s21  ;;  %vm302_vm3 = vcmask 965632   ;;  %v271_v20 = vld [vmem:[#allocation5 + $0x8] sm:$0xf]  ;;  %v297_v21 = vld [vmem:[#allocation5 + $0xc] sm:$0xf]  ;;  %s458_s24 = sshll.u32 %s805_s10, 3 }
  0x34   : > { %264 = vmatpush.bf16.msra.mxu1 %v471_v8  ;;  %v547_v30 = vld [vmem:[%s860_s2] ss:$0 sm:$0xff]  ;;  %s476_s27 = sshll.u32 %s731_s16, 3  ;;  %s207_s7 = scalar_lea.vmem [#allocation7], %s458_s24 }
  0x35   : > { %s363_s30 = scalar_lea.hbm %s861_s3, %s476_s27  ;;  %s365_s8 = sshll.u32 %s207_s7, 4  ;;  %s366_s8 = int_to_ptr.vmem [resolvable:$true] %s365_s8 }
  0x36   : > { %s367_s6 = sshll.u32 %s363_s30, 4  ;;  %s353_s16 = scalar_lea.sflag [#allocation4], %s805_s10  ;;  %s368_s6 = int_to_ptr.hbm [resolvable:$true] %s367_s6 }
  0x37   : > { %472 = vmatmul.msk.bf16.vlgmr.msra.gmra.mxu1 %vm231_vm0, %v209_v9  ;;  %s624_s9 = sshra.s32 %s368_s6, 4  ;;  %s625_s9 = int_to_ptr.hbm [resolvable:$true] %s624_s9 }
  0x38   : > { %s626_s11 = scalar_lea.hbm %s625_s9, 8  ;;  %p631_p11 = scmp.lt.s32.totalorder %s625_s9, %s861_s3 }
  0x39   : > { %p627_p1 = scmp.ne.s32.totalorder %s625_s9, %s626_s11 }
  0x3a   : > { %300 = vrot.lane.b32.xlu1 %v466_v5, %s687_s23  ;;  %274 = vrot.lane.b32.xlu0 %v466_v5, %s688_s17  ;;  %s630_s23 = scalar_lea.hbm %s861_s3, 16 }
  0x3b   : > { %226 = vrot.lane.b32.xlu2 %v466_v5, %s689_s21  ;;  %p628_p4 = pnand %p627_p1, %p777_p7  ;;  %p632_p9 = scmp.lt.s32.totalorder %s630_s23, %s626_s11 }
  0x3d   : > { %p629_p8 = pneg %p628_p4  ;;  %p633_p2 = por %p632_p9, %p631_p11 }
  0x3f   : > { %p634_p10 = pnand %p633_p2, %p629_p8 }
  0x8d   : > { %v225_v10 = vpop.permute.xlu2 %224 }
  0x95   : > { %v227_v11 = vpop.permute.xlu2 %226 }
  0x96   : > { %v229_v12 = vsel %vm228_vm1, %v225_v10, %v227_v11 }
  0x97   : > { %242 = vmatpush.bf16.msra.mxu0 %v229_v12 }
  0x9a   : > { %467 = vmatmul.msk.bf16.vlgmr.msra.gmra.mxu0 %vm231_vm0, %v213_v13 }
  0xa4   : > { %v299_v14 = vpop.permute.xlu1 %298  ;;  %v273_v15 = vpop.permute.xlu0 %272 }
  0xac   : > { %v301_v16 = vpop.permute.xlu1 %300  ;;  %v275_v17 = vpop.permute.xlu0 %274 }
  0xad   : > { %v277_v18 = vsel %vm276_vm2, %v273_v15, %v275_v17  ;;  %v303_v19 = vsel %vm302_vm3, %v299_v14, %v301_v16 }
  0xae   : > { %289 = vmatpush.bf16.msra.mxu2 %v277_v18  ;;  %315 = vmatpush.bf16.msra.mxu3 %v303_v19 }
  0xb1   : > { %473 = vmatmul.msk.bf16.vlgmr.msra.gmra.mxu2 %vm231_vm0, %v271_v20  ;;  %474 = vmatmul.msk.bf16.vlgmr.msra.gmra.mxu3 %vm231_vm0, %v297_v21 }
  0xb4   : > { %v266_v22 = vpop.f32.mrf.mxu1 }
  0xbc   : > { %v268_v23 = vpop.f32.mrf.mxu1 }
 0x117   : > { %v244_v24 = vpop.f32.mrf.mxu0 }
 0x118   : > { %v267_v26 = vadd.f32 %v266_v22, %v244_v24 }
 0x11f   : > { %v246_v25 = vpop.f32.mrf.mxu0 }
 0x134   : > { %v291_v27 = vpop.f32.mrf.mxu2  ;;  %v317_v28 = vpop.f32.mrf.mxu3 }
 0x135   : > { %v295_v29 = vadd.f32 %v291_v27, %v267_v26 }
 0x137   : > { %v321_v31 = vadd.f32 %v317_v28, %v295_v29 }
 0x139   : > { %v326_v32 = vmul.f32 %v547_v30, %v321_v31 }
 0x13b   : > { %327 = vadd.xlane.f32.xlu0 %v326_v32 }
 0x13c   : > { %v293_v33 = vpop.f32.mrf.mxu2  ;;  %v319_v34 = vpop.f32.mrf.mxu3 }
 0x1ae   : > { %v328_v35 = vpop.xlane.xlu0 %327 }
 0x1af   : > { %v329_v36 = vmul.f32 0.015625, %v328_v35 }
 0x1b1   : > { %v330_v37 = vsub.f32 %v321_v31, %v329_v36 }
 0x1b3   : > { %v331_v38 = vmul.f32 %v547_v30, %v330_v37 }
 0x1b5   : > { %v332_v39 = vmul.f32 %v331_v38, %v331_v38 }
 0x1b7   : > { %333 = vadd.xlane.f32.xlu1 %v332_v39 }
 0x22a   : > { %v334_v40 = vpop.xlane.xlu1 %333 }
 0x22b   : > { %v335_v41 = vmul.f32 0.015625, %v334_v40 }
 0x22d   : > { %v336_v42 = vadd.f32 1e-05, %v335_v41 }
 0x22f   : > { %548 = vrsqrt.f32 %v336_v42  ;;  %vm343_vm5 = vweird.f32 %v336_v42 }
 0x235   : > { %v549_v43 = vpop.eup %548 }
 0x236   : > { %v338_v44 = vmul.f32 %v549_v43, %v336_v42  ;;  %vm344_vm4 = vweird.f32 %v549_v43 }
 0x237   : > { %vm345_vm6 = vmor %vm343_vm5, %vm344_vm4 }
 0x238   : > { %v339_v45 = vmul.f32 %v549_v43, %v338_v44 }
 0x23a   : > { %v340_v46 = vmul.f32 0.5, %v339_v45 }
 0x23c   : > { %v341_v47 = vsub.f32 1.5, %v340_v46 }
 0x23e   : > { %v342_v48 = vmul.f32 %v549_v43, %v341_v47 }
 0x240   : > { %v346_v49 = vsel %vm345_vm6, %v549_v43, %v342_v48 }
 0x241   : > { %v347_v50 = vmul.f32 %v346_v49, %v330_v37 }
 0x243   : > { %vm348_vm7 = vcmp.ge.f32.partialorder %v347_v50, 0.0  ;;  %v349_v51 = vmul.f32 0.2, %v347_v50 }
 0x245   : > { %v350_v52 = vsel %vm348_vm7, %v347_v50, %v349_v51 }
 0x246   : > { %351 = vst [vmem:[%s207_s7] sm:$0xff] %v350_v52 }
 0x247   : > { %637 = shalt.err (!%p634_p10)
}
 0x248   : > { %489 = dma.vmem_to_hbm [thread:$0]  (%p777_p7), %s366_s8, 128, %s368_s6, %s353_s16  }
 0x249 PF: > { %s379_s10 = sand.u32 1, %s668_s12   ;;  %p867_p12 = scmp.ge.s32.totalorder %s680_s15, 2 }
 0x24a   : > { %s380_s18 = scalar_lea.sflag [#allocation4], %s379_s10 }
 0x24b   : > { %p500_p13 = pnand %p867_p12, %p745_p6 }
 0x24d   : > { %p501_p0 = pneg %p500_p13 }
 0x24f   : > { %663 = dma.done.wait (%p501_p0), %s380_s18, 128  }
 0x250   : > { %665 = vsyncadd (%p501_p0), %s380_s18, 4294967168  ;;  %p17_p3 = scmp.ge.s32.totalorder %s763_s26, 4   ;;  %s868_s12 = smov %s672_s13 }
 0x251   : > { %s869_s13 = smov %s676_s14  ;;  %s870_s14 = smov %s773_s4 }
 0x252   : > { %s871_s15 = smov %s763_s26  ;;  %19 = sbr.rel (!%p17_p3) target bundleno = 6 (0x6), region = 84 }
 0x257   :  { %386 = vsyncpa [#allocation3], 1 }
 0x258   :  { %388 = vsyncpa [#allocation3 + $0x1], 1 }
 0x259   :  { %389 = vsyncpa [#allocation6], 1 }
 0x25a   :  { %390 = vsyncpa [#allocation4], 1 }
 0x25b   :  { %392 = vsyncpa [#allocation4 + $0x1], 1 }

</bundles_post_ra>
